<compile_context>
chip_gen: v5e
topology: v5e:2x2
jax: 0.10.0
libtpu: 0.0.40
codegen_flags: <defaults>
</compile_context>

<pallas_src>
import jax
import jax.numpy as jnp
import numpy as np
from jax.experimental import pallas as pl
from jax.experimental.pallas import tpu as pltpu

_LANE = 128

# Cached trace-only feature check: does this JAX accept pl.Buffered(1) on TPU?
_SINGLE_BUFFER_OK = None


def _round_up(x, m):
    return ((x + m - 1) // m) * m


def _pick_h_block(h_pad, target=1024):
    """Largest multiple of 128 that divides h_pad and is <= target."""
    if h_pad <= target:
        return h_pad
    best = 128
    d = 128
    while d <= target:
        if h_pad % d == 0:
            best = d
        d += 128
    return best


def _copy_kernel(x_ref, o_ref):
    o_ref[...] = x_ref[...]


def _single_buffer_supported():
    """Trace-only (no execution) check that pl.Buffered(1) lowers cleanly."""
    global _SINGLE_BUFFER_OK
    if _SINGLE_BUFFER_OK is None:
        try:
            call = pl.pallas_call(
                _copy_kernel,
                out_shape=jax.ShapeDtypeStruct((8, 128), jnp.float32),
                grid=(1,),
                in_specs=[pl.BlockSpec((8, 128), lambda i: (0, 0),
                                       pipeline_mode=pl.Buffered(1))],
                out_specs=pl.BlockSpec((8, 128), lambda i: (0, 0)),
            )
            jax.jit(call).lower(jax.ShapeDtypeStruct((8, 128), jnp.float32))
            _SINGLE_BUFFER_OK = True
        except Exception:
            _SINGLE_BUFFER_OK = False
    return _SINGLE_BUFFER_OK


def _make_kernel(h_blk, n_hk):
    """Fused relu(x@W1+b1)@W2+b2 kernel, hidden dim chunked into n_hk blocks."""
    def kernel(x_ref, w1_ref, b1_ref, w2_ref, b2_ref, o_ref):
        # Cast the activation to the weight/compute dtype inside VMEM (avoids a
        # full extra HBM read+write pass in the wrapper).
        x = x_ref[...].astype(w1_ref.dtype)
        acc = jnp.zeros((x.shape[0], o_ref.shape[1]), jnp.float32)
        for hk in range(n_hk):                 # static unroll over hidden chunks
            lo = hk * h_blk
            h = jnp.dot(x, w1_ref[:, lo:lo + h_blk],
                        preferred_element_type=jnp.float32)
            # nn.ReLU (norm = Identity, dropout p=0.0 -> identity).
            h = jnp.maximum(h + b1_ref[:, lo:lo + h_blk], 0.0)
            # channel_shuffle is folded into W2 as a row permutation.
            acc = acc + jnp.dot(h.astype(w2_ref.dtype),
                                w2_ref[lo:lo + h_blk, :],
                                preferred_element_type=jnp.float32)
        o_ref[...] = (acc + b2_ref[...]).astype(o_ref.dtype)
    return kernel


def prepare_group_conv_mlp_params(w1, b1, w2, b2, groups,
                                  compute_dtype=jnp.bfloat16):
    """One-time glue (call once, reuse across forward calls).

    Expands grouped 1x1-conv weights to dense block-diagonal matrices, folds
    channel_shuffle into fc2's weight, zero-pads only the hidden (lane) dim to
    a multiple of 128, and casts weights to `compute_dtype`.
    """
    w1 = np.asarray(w1, np.float32)
    b1 = np.asarray(b1, np.float32)
    w2 = np.asarray(w2, np.float32)
    b2 = np.asarray(b2, np.float32)

    G = int(groups)
    H, Cg = w1.shape
    O, Hg = w2.shape
    C = Cg * G
    assert H % G == 0 and O % G == 0 and H // G == Hg
    Hgo = H // G
    Og = O // G

    H_pad = _round_up(H, _LANE)

    # fc1 as (C, H_pad) block-diagonal so that  h = x(M,C) @ W1.
    w1_bd = np.zeros((C, H_pad), np.float32)
    for g in range(G):
        w1_bd[g * Cg:(g + 1) * Cg, g * Hgo:(g + 1) * Hgo] = \
            w1[g * Hgo:(g + 1) * Hgo, :].T

    # fc2 as (H_pad, O) block-diagonal in the *pre-shuffle* hidden layout.
    w2_bd = np.zeros((H_pad, O), np.float32)
    for g in range(G):
        w2_bd[g * Hg:(g + 1) * Hg, g * Og:(g + 1) * Og] = \
            w2[g * Og:(g + 1) * Og, :].T

    # Fold the module's channel_shuffle (reshape (H//G, G) -> permute -> flat):
    #   shuffled[q] = h[src[q]],  src[q] = (q % Hgo) * G + q // Hgo
    #   y[o] = sum_q shuffled[q] * w2_bd[q, o]  =>  w2_eff[src[q], o] = w2_bd[q, o]
    q = np.arange(H)
    src = (q % Hgo) * G + (q // Hgo)
    w2_eff = np.zeros_like(w2_bd)
    w2_eff[src, :] = w2_bd[:H, :]

    b1_pad = np.zeros((1, H_pad), np.float32)
    b1_pad[0, :H] = b1
    b2_row = b2.reshape(1, O).astype(np.float32)

    return {
        "w1": jnp.asarray(w1_bd, compute_dtype),
        "b1": jnp.asarray(b1_pad, jnp.float32),
        "w2": jnp.asarray(w2_eff, compute_dtype),
        "b2": jnp.asarray(b2_row, jnp.float32),
        "C": C, "O": O, "H_pad": H_pad,
        "compute_dtype": compute_dtype,
    }


def group_conv_mlp_pallas(x, params, tm=512, out_dtype=None):
    """x: (B, N, C); params from prepare_group_conv_mlp_params. Returns (B, N, O).

    out_dtype: optional override (e.g. jnp.bfloat16) to halve output writeback
    bytes when the consumer tolerates it; defaults to x.dtype.
    """
    B, N, C = x.shape
    assert C == params["C"], "channel mismatch vs prepared params"
    H_pad, O = params["H_pad"], params["O"]
    cdt = params["compute_dtype"]
    out_dtype = x.dtype if out_dtype is None else out_dtype

    M = B * N
    x2d = x.reshape(M, C)                      # no host-side cast / pad passes

    # Token tile: multiple of 8 (sublane); 512 default amortizes per-step
    # overhead and the resident-weight matmul setup. Ragged last block is
    # masked by Pallas (no jnp.pad over M, no post-kernel slice).
    tm_eff = min(int(tm), _round_up(M, 8))
    h_blk = _pick_h_block(H_pad)
    n_hk = H_pad // h_blk

    single_buffer = _single_buffer_supported()

    # VMEM budget from the actual working set, capped at 75% of physical VMEM
    # (v7x: 64 MiB/TC -> 48 MiB ceiling; v5e/v6e: 128 MiB -> 96 MiB ceiling).
    x_isz = jnp.dtype(x.dtype).itemsize
    w_isz = jnp.dtype(cdt).itemsize
    o_isz = jnp.dtype(out_dtype).itemsize
    w_bufs = 1 if single_buffer else 2
    weight_bytes = w_bufs * ((C * H_pad + H_pad * O) * w_isz + (H_pad + O) * 4)

    def working_set(tm_):
        io = 2 * tm_ * C * x_isz + 2 * tm_ * O * o_isz          # dbl-buffered x/y
        scratch = tm_ * h_blk * 4 + tm_ * O * 4 + tm_ * C * w_isz
        return weight_bytes + io + scratch

    try:
        vmem_cap = int(getattr(pltpu.get_tpu_info(), "vmem_capacity_bytes",
                               64 << 20))
    except Exception:
        vmem_cap = 64 << 20                    # conservative: v7x per-TC physical
    vmem_ceiling = max((vmem_cap * 3) // 4, 32 << 20)
    while tm_eff > 64 and working_set(tm_eff) + (4 << 20) > vmem_ceiling:
        tm_eff = max(64, _round_up(tm_eff // 2, 8))
    vmem_limit = int(min(max(working_set(tm_eff) + (8 << 20), 32 << 20),
                         vmem_ceiling))

    if single_buffer:
        def const_spec(shape):
            return pl.BlockSpec(shape, lambda i: (0, 0),
                                pipeline_mode=pl.Buffered(1))
    else:
        def const_spec(shape):
            return pl.BlockSpec(shape, lambda i: (0, 0))

    call = pl.pallas_call(
        _make_kernel(h_blk, n_hk),
        out_shape=jax.ShapeDtypeStruct((M, O), out_dtype),
        grid=(pl.cdiv(M, tm_eff),),
        in_specs=[
            pl.BlockSpec((tm_eff, C), lambda i: (i, 0)),   # x token tile
            const_spec((C, H_pad)),                        # W1 (resident)
            const_spec((1, H_pad)),                        # b1
            const_spec((H_pad, O)),                        # W2 (shuffle folded)
            const_spec((1, O)),                            # b2
        ],
        out_specs=pl.BlockSpec((tm_eff, O), lambda i: (i, 0)),
        compiler_params=pltpu.CompilerParams(
            dimension_semantics=("parallel",),             # token axis -> TCs
            vmem_limit_bytes=vmem_limit,
        ),
    )
    y2d = call(x2d, params["w1"], params["b1"], params["w2"], params["b2"])
    return y2d.reshape(B, N, O)


def group_conv_mlp_reference(x, w1, b1, w2, b2, groups):
    """Pure-JAX transcription of the PyTorch forward (for validation)."""
    B, N, C = x.shape
    G = groups
    H, Cg = w1.shape
    O, Hg = w2.shape
    Hgo = H // G
    Og = O // G

    xc = jnp.transpose(x, (0, 2, 1))                 # (B, C, N)  == NCHW, W=1
    outs = []
    for g in range(G):                               # fc1: grouped 1x1 conv
        wg = w1[g * Hgo:(g + 1) * Hgo, :]
        xg = xc[:, g * Cg:(g + 1) * Cg, :]
        outs.append(jnp.einsum('hc,bcn->bhn', wg, xg))
    h = jnp.concatenate(outs, axis=1) + b1[None, :, None]
    h = jnp.maximum(h, 0.0)
    gc = H // G                                      # channel_shuffle (module def)
    h = h.reshape(B, gc, G, N).transpose(0, 2, 1, 3).reshape(B, H, N)
    outs = []
    for g in range(G):                               # fc2: grouped 1x1 conv
        wg = w2[g * Og:(g + 1) * Og, :]
        hg = h[:, g * Hg:(g + 1) * Hg, :]
        outs.append(jnp.einsum('oh,bhn->bon', wg, hg))
    y = jnp.concatenate(outs, axis=1) + b2[None, :, None]
    return jnp.transpose(y, (0, 2, 1))               # (B, N, O)


if __name__ == "__main__":
    # Small shapes consistent with the module.
    B, N = 2, 8
    in_features, hidden_features, out_features, groups = 16, 32, 16, 4

    key = jax.random.PRNGKey(0)
    kx, k1, kb1, k2, kb2 = jax.random.split(key, 5)

    x = jax.random.normal(kx, (B, N, in_features), dtype=jnp.float32)
    w1 = jax.random.normal(k1, (hidden_features, in_features // groups),
                           dtype=jnp.float32) * 0.1
    b1 = jax.random.normal(kb1, (hidden_features,), dtype=jnp.float32) * 0.1
    w2 = jax.random.normal(k2, (out_features, hidden_features // groups),
                           dtype=jnp.float32) * 0.1
    b2 = jax.random.normal(kb2, (out_features,), dtype=jnp.float32) * 0.1

    y_ref = group_conv_mlp_reference(x, w1, b1, w2, b2, groups)

    # 1) f32 compute path: tight numerical check of the fused kernel math.
    params_f32 = prepare_group_conv_mlp_params(
        w1, b1, w2, b2, groups, compute_dtype=jnp.float32)
    y_f32 = jax.block_until_ready(group_conv_mlp_pallas(x, params_f32))
    np.testing.assert_allclose(np.asarray(y_f32), np.asarray(y_ref),
                               rtol=1e-4, atol=1e-5)

    # 2) bf16 fast path (MXU-native weights, in-kernel cast, f32 accumulation).
    params_bf16 = prepare_group_conv_mlp_params(
        w1, b1, w2, b2, groups, compute_dtype=jnp.bfloat16)
    y_bf16 = jax.block_until_ready(group_conv_mlp_pallas(x, params_bf16))
    np.testing.assert_allclose(np.asarray(y_bf16), np.asarray(y_ref),
                               rtol=2e-2, atol=2e-2)

    # 3) Ragged token count (M not a multiple of the tile) exercises the
    #    masked last block (no host-side padding anywhere).
    x_rag = jax.random.normal(kx, (2, 13, in_features), dtype=jnp.float32)
    y_rag = jax.block_until_ready(group_conv_mlp_pallas(x_rag, params_bf16))
    y_rag_ref = group_conv_mlp_reference(x_rag, w1, b1, w2, b2, groups)
    np.testing.assert_allclose(np.asarray(y_rag), np.asarray(y_rag_ref),
                               rtol=2e-2, atol=2e-2)

    print("KERNEL_OK")
</pallas_src>

<mosaic_0001>
module attributes {stable_mosaic.version = 11 : i64} {
  func.func @kernel(%arg0: i32, %arg1: memref<16x16xf32, #tpu.memory_space<vmem>>, %arg2: memref<16x128xf32, #tpu.memory_space<vmem>>, %arg3: memref<1x128xf32, #tpu.memory_space<vmem>>, %arg4: memref<128x16xf32, #tpu.memory_space<vmem>>, %arg5: memref<1x16xf32, #tpu.memory_space<vmem>>, %arg6: memref<16x16xf32, #tpu.memory_space<vmem>>) attributes {dimension_semantics = [#tpu.dimension_semantics<parallel>], iteration_bounds = array<i64: 1>, scalar_prefetch = 0 : i64, scratch_operands = 0 : i64, tpu.core_type = #tpu.core_type<tc>, window_params = [{transform_indices = @transform_0, window_bounds = array<i64: 16, 16>}, {pipeline_mode = #tpu.pipeline_mode<synchronous>, transform_indices = @transform_1, window_bounds = array<i64: 16, 128>}, {pipeline_mode = #tpu.pipeline_mode<synchronous>, transform_indices = @transform_2, window_bounds = array<i64: 1, 128>}, {pipeline_mode = #tpu.pipeline_mode<synchronous>, transform_indices = @transform_3, window_bounds = array<i64: 128, 16>}, {pipeline_mode = #tpu.pipeline_mode<synchronous>, transform_indices = @transform_4, window_bounds = array<i64: 1, 16>}, {transform_indices = @transform_5, window_bounds = array<i64: 16, 16>}]} {
    %c0 = arith.constant 0 : index
    %c0_0 = arith.constant 0 : index
    %0 = vector.load %arg1[%c0, %c0_0] : memref<16x16xf32, #tpu.memory_space<vmem>>, vector<16x16xf32>
    %cst = arith.constant 0.000000e+00 : f32
    %1 = vector.broadcast %cst : f32 to vector<16x16xf32>
    %c0_1 = arith.constant 0 : index
    %c0_2 = arith.constant 0 : index
    %2 = vector.load %arg2[%c0_1, %c0_2] : memref<16x128xf32, #tpu.memory_space<vmem>>, vector<16x128xf32>
    %cst_3 = arith.constant dense<0.000000e+00> : vector<16x128xf32>
    %3 = tpu.matmul %0, %2, %cst_3 {dimension_numbers = #tpu.dot_dimension_numbers<[1], [0], [0], [1], [0, 0, 1, 1], [], []>} : vector<16x16xf32>, vector<16x128xf32>, vector<16x128xf32> -> vector<16x128xf32>
    %c0_4 = arith.constant 0 : index
    %c0_5 = arith.constant 0 : index
    %4 = vector.load %arg3[%c0_4, %c0_5] : memref<1x128xf32, #tpu.memory_space<vmem>>, vector<1x128xf32>
    %5 = vector.broadcast %4 : vector<1x128xf32> to vector<16x128xf32>
    %6 = arith.addf %3, %5 : vector<16x128xf32>
    %cst_6 = arith.constant 0.000000e+00 : f32
    %7 = vector.broadcast %cst_6 : f32 to vector<16x128xf32>
    %8 = arith.maximumf %6, %7 : vector<16x128xf32>
    %c0_7 = arith.constant 0 : index
    %c0_8 = arith.constant 0 : index
    %9 = vector.load %arg4[%c0_7, %c0_8] : memref<128x16xf32, #tpu.memory_space<vmem>>, vector<128x16xf32>
    %cst_9 = arith.constant dense<0.000000e+00> : vector<16x16xf32>
    %10 = tpu.matmul %8, %9, %cst_9 {dimension_numbers = #tpu.dot_dimension_numbers<[1], [0], [0], [1], [0, 0, 1, 1], [], []>} : vector<16x128xf32>, vector<128x16xf32>, vector<16x16xf32> -> vector<16x16xf32>
    %11 = arith.addf %1, %10 : vector<16x16xf32>
    %c0_10 = arith.constant 0 : index
    %c0_11 = arith.constant 0 : index
    %12 = vector.load %arg5[%c0_10, %c0_11] : memref<1x16xf32, #tpu.memory_space<vmem>>, vector<1x16xf32>
    %13 = vector.broadcast %12 : vector<1x16xf32> to vector<16x16xf32>
    %14 = arith.addf %11, %13 : vector<16x16xf32>
    %c0_12 = arith.constant 0 : index
    %c0_13 = arith.constant 0 : index
    %15 = vector.load %arg6[%c0_12, %c0_13] : memref<16x16xf32, #tpu.memory_space<vmem>>, vector<16x16xf32>
    tpu.vector_store %arg6[%c0_12, %c0_13], %14 {strides = array<i32>} : memref<16x16xf32, #tpu.memory_space<vmem>>, vector<16x16xf32>,
    return
  }
  func.func @transform_0(%arg0: i32) -> (i32, i32) {
    %c0_i32 = arith.constant 0 : i32
    %c0_i32_0 = arith.constant 0 : i32
    return %arg0, %c0_i32 : i32, i32
  }
  func.func @transform_1(%arg0: i32) -> (i32, i32) {
    %c0_i32 = arith.constant 0 : i32
    %c0_i32_0 = arith.constant 0 : i32
    %c0_i32_1 = arith.constant 0 : i32
    return %c0_i32, %c0_i32_0 : i32, i32
  }
  func.func @transform_2(%arg0: i32) -> (i32, i32) {
    %c0_i32 = arith.constant 0 : i32
    %c0_i32_0 = arith.constant 0 : i32
    %c0_i32_1 = arith.constant 0 : i32
    return %c0_i32, %c0_i32_0 : i32, i32
  }
  func.func @transform_3(%arg0: i32) -> (i32, i32) {
    %c0_i32 = arith.constant 0 : i32
    %c0_i32_0 = arith.constant 0 : i32
    %c0_i32_1 = arith.constant 0 : i32
    return %c0_i32, %c0_i32_0 : i32, i32
  }
  func.func @transform_4(%arg0: i32) -> (i32, i32) {
    %c0_i32 = arith.constant 0 : i32
    %c0_i32_0 = arith.constant 0 : i32
    %c0_i32_1 = arith.constant 0 : i32
    return %c0_i32, %c0_i32_0 : i32, i32
  }
  func.func @transform_5(%arg0: i32) -> (i32, i32) {
    %c0_i32 = arith.constant 0 : i32
    %c0_i32_0 = arith.constant 0 : i32
    return %arg0, %c0_i32 : i32, i32
  }
}

</mosaic_0001>

<bundles_post_ra>
// kernel: tpu_custom_call.1
= control target key start
LH: loop header
LB: loop body
LE: loop exit
PB: predicated region body
PF: predicated region fallthrough
CT: control target
= control target key end

     0   :  { %vm29_vm0 = vcmask 130048   ;;  %s279_s0 = inlined_call_operand.vmem [shape: f32[16,16], index: 0, kind: input, shape index: {}]   ;;  %s280_s1 = inlined_call_operand.vmem [shape: f32[16,128], index: 1, kind: input, shape index: {}]   ;;  %s281_s2 = inlined_call_operand.vmem [shape: f32[1,128], index: 2, kind: input, shape index: {}]   ;;  %s282_s3 = inlined_call_operand.vmem [shape: f32[128,16], index: 3, kind: input, shape index: {}]   ;;  %s283_s4 = inlined_call_operand.vmem [shape: f32[1,16], index: 4, kind: input, shape index: {}]   ;;  %s284_s5 = inlined_call_operand.hbm [shape: f32[16,16], index: 5, kind: output, shape index: {}]  }
   0x1   :  { %v24_v0 = vld [vmem:[%s280_s1 + $0x8] sm:$0xff]  ;;  %v23_v1 = vld [vmem:[%s280_s1] sm:$0xff]  ;;  %v76_v3 = vld [vmem:[%s282_s3 + $0x78] sm:$0xff] }
   0x2   :  { %50 = vmatpush.msra.mxu0 %v24_v0  ;;  %v21_v2 = vld [vmem:[%s279_s0] sm:$0xff]  ;;  %v75_v4 = vld [vmem:[%s282_s3 + $0x70] sm:$0xff]  ;;  %81 = vmatpush.msra.mxu1 %v76_v3  ;;  %v74_v5 = vld [vmem:[%s282_s3 + $0x68] sm:$0xff] }
   0x3   :  { %126 = vmatpush.msra.mxu2 %v76_v3  ;;  %v73_v6 = vld [vmem:[%s282_s3 + $0x60] sm:$0xff] }
   0x4   :  { %51 = vmatpush.msra.mxu0 %v23_v1  ;;  %82 = vmatpush.msra.mxu1 %v75_v4 }
   0x5   :  { %124 = vmatmul.msk.f32.vlgmr.msra.gmra.mxu0 %vm29_vm0, %v21_v2  ;;  %127 = vmatpush.msra.mxu2 %v75_v4 }
   0x6   :  { %83 = vmatpush.msra.mxu1 %v74_v5 }
   0x7   :  { %10 = vsyncpa [#allocation3], 0  ;;  %v72_v7 = vld [vmem:[%s282_s3 + $0x58] sm:$0xff]  ;;  %128 = vmatpush.msra.mxu2 %v74_v5  ;;  %v22_v8 = vld [vmem:[%s279_s0 + $0x8] sm:$0xff]  ;;  %s112_s11 = sshll.u32 %s284_s5, 4  ;;  %s174_s12 = smov 128   ;;  %s113_s11 = int_to_ptr.hbm [resolvable:$true] %s112_s11 }
   0x8   :  { %84 = vmatpush.msra.mxu1 %v73_v6  ;;  %v71_v9 = vld [vmem:[%s282_s3 + $0x50] sm:$0xff]  ;;  %v70_v10 = vld [vmem:[%s282_s3 + $0x48] sm:$0xff]  ;;  %v69_v11 = vld [vmem:[%s282_s3 + $0x40] sm:$0xff]  ;;  %s175_s13 = smov 8  }
   0x9   :  { %129 = vmatpush.msra.mxu2 %v73_v6  ;;  %v68_v12 = vld [vmem:[%s282_s3 + $0x38] sm:$0xff]  ;;  %v67_v13 = vld [vmem:[%s282_s3 + $0x30] sm:$0xff]  ;;  %v66_v14 = vld [vmem:[%s282_s3 + $0x28] sm:$0xff] }
   0xa   :  { %85 = vmatpush.msra.mxu1 %v72_v7  ;;  %v65_v15 = vld [vmem:[%s282_s3 + $0x20] sm:$0xff]  ;;  %v64_v16 = vld [vmem:[%s282_s3 + $0x18] sm:$0xff]  ;;  %v63_v17 = vld [vmem:[%s282_s3 + $0x10] sm:$0xff] }
   0xb   :  { %130 = vmatpush.msra.mxu2 %v72_v7  ;;  %v62_v18 = vld [vmem:[%s282_s3 + $0x8] sm:$0xff]  ;;  %v61_v19 = vld [vmem:[%s282_s3] sm:$0xff]  ;;  %s173_s3 = smov [#allocation2]  }
   0xc   :  { %86 = vmatpush.msra.mxu1 %v71_v9  ;;  %v145_v20 = vld [vmem:[%s281_s2] ss:$0 sm:$0xff]  ;;  %s110_s9 = sshll.u32 %s173_s3, 4  ;;  %s111_s9 = int_to_ptr.vmem [resolvable:$true] %s110_s9 }
   0xd   :  { %125 = vmatmul.msk.f32.gmra.mxu0 %vm29_vm0, %v22_v8  ;;  %131 = vmatpush.msra.mxu2 %v71_v9  ;;  %v146_v27 = vld [vmem:[%s283_s4] ss:$0 sm:$0xff] }
   0xe   :  { %87 = vmatpush.msra.mxu1 %v70_v10 }
   0xf   :  { %132 = vmatpush.msra.mxu2 %v70_v10 }
  0x10   :  { %88 = vmatpush.msra.mxu1 %v69_v11 }
  0x11   :  { %133 = vmatpush.msra.mxu2 %v69_v11 }
  0x12   :  { %89 = vmatpush.msra.mxu1 %v68_v12 }
  0x13   :  { %134 = vmatpush.msra.mxu2 %v68_v12 }
  0x14   :  { %90 = vmatpush.msra.mxu1 %v67_v13 }
  0x15   :  { %135 = vmatpush.msra.mxu2 %v67_v13 }
  0x16   :  { %91 = vmatpush.msra.mxu1 %v66_v14 }
  0x17   :  { %136 = vmatpush.msra.mxu2 %v66_v14 }
  0x18   :  { %92 = vmatpush.msra.mxu1 %v65_v15 }
  0x19   :  { %137 = vmatpush.msra.mxu2 %v65_v15 }
  0x1a   :  { %93 = vmatpush.msra.mxu1 %v64_v16 }
  0x1b   :  { %138 = vmatpush.msra.mxu2 %v64_v16 }
  0x1c   :  { %94 = vmatpush.msra.mxu1 %v63_v17 }
  0x1d   :  { %139 = vmatpush.msra.mxu2 %v63_v17 }
  0x1e   :  { %95 = vmatpush.msra.mxu1 %v62_v18 }
  0x1f   :  { %140 = vmatpush.msra.mxu2 %v62_v18 }
  0x20   :  { %96 = vmatpush.msra.mxu1 %v61_v19 }
  0x21   :  { %141 = vmatpush.msra.mxu2 %v61_v19 }
  0x82   :  { %v53_v21 = vpop.f32.mrf.mxu0 }
  0x83   :  { %v54_v22 = vadd.f32 %v145_v20, %v53_v21 }
  0x85   :  { %v59_v23 = vmax.f32 %v54_v22, 0.0 }
  0x87   :  { %97 = vmatmul.f32.vlgmr.msra.gmra.mxu1 %v59_v23 }
  0x8a   :  { %v56_v24 = vpop.f32.mrf.mxu0 }
  0x8b   :  { %v57_v25 = vadd.f32 %v145_v20, %v56_v24 }
  0x8d   :  { %v60_v26 = vmax.f32 %v57_v25, 0.0 }
  0x8f   :  { %100 = vmatmul.f32.vlgmr.msra.gmra.mxu2 %v60_v26 }
 0x104   :  { %v98_v28 = vpop.f32.mrf.mxu1 }
 0x105   :  { %v99_v29 = vadd.f32 %v146_v27, %v98_v28 }
 0x107   :  { %104 = vst.msk [vmem:[#allocation2] sm:$0xff] %vm29_vm0, %v99_v29 }
 0x112   :  { %v101_v30 = vpop.f32.mrf.mxu2 }
 0x113   :  { %v102_v31 = vadd.f32 %v146_v27, %v101_v30 }
 0x115   :  { %105 = vst.msk [vmem:[#allocation2 + $0x8] sm:$0xff] %vm29_vm0, %v102_v31 }
 0x116   :  { %118 = dma.vmem_to_hbm [thread:$0]  %s111_s9, 256, %s113_s11, [#allocation3], %s174_s12, %s174_s12, %s175_s13  }
 0x117   :  { %171 = dma.done.wait [#allocation3], 256  }
 0x118   :  { %172 = vsyncadd [#allocation3], 4294967040 }
 0x119   :  { %123 = vsyncpa [#allocation3], 1 }

</bundles_post_ra>
